<compile_context>
chip_gen: v7x
topology: tpu7x:2x2x1
jax: 0.10.0
libtpu: 0.0.40
codegen_flags: <defaults>
</compile_context>

<pallas_src>
import functools
import numpy as np
import jax
import jax.numpy as jnp
from jax import lax
from jax.experimental import pallas as pl
from jax.experimental.pallas import tpu as pltpu

# ----------------------------- configuration -------------------------------
INPUT_SIZE = 20          # vocab size (e.g. amino acids)
EMBED_SIZE = 16
NUM_FEAT = 8             # numeric_feature_dim
HIDDEN = 32              # hidden_dim
D_IN = EMBED_SIZE + NUM_FEAT   # LSTM input size (CONCAT_AFTER=False)
BATCH = 4
SEQ_LEN = 8
SUBLANE = 8              # pad batch to a multiple of one sublane group


# ------------------------------ Pallas kernel -------------------------------
def epitope_fused_kernel(seq_ref, prop_ref, emb_proj_ref, w_prop_ref,
                         w_hh_ref, b_ref, w_lin_ref, b_lin_ref, y_ref,
                         *, n_steps, batch):
    """Fused (embedding -> concat -> LSTM -> linear -> sigmoid), one invocation.

    seq_ref:      (T*B, 1)   int32 token ids, time-major rows (batch padded)
    prop_ref:     (T*B, F)   numeric features, time-major
    emb_proj_ref: (V, 4H)    embedding table pre-multiplied by W_ih[:, :E]^T
    w_prop_ref:   (F, 4H)    W_ih[:, E:]^T  (numeric-feature projection)
    w_hh_ref:     (H, 4H)    transposed weight_hh (gate order i, f, g, o)
    b_ref:        (1, 4H)    b_ih + b_hh
    w_lin_ref:    (1, H)     linear head weight (row)
    b_lin_ref:    (1,)       linear head bias (SMEM scalar)
    y_ref:        (1, T*B)   sigmoid(linear(h_t)), lane-dense row
    """
    TB = n_steps * batch
    H = w_hh_ref.shape[0]
    V = emb_proj_ref.shape[0]

    # ---- fused embedding lookup + hoisted input projection --------------
    # one_hot(tokens) @ (E @ W_e) + prop @ W_p  ==  [embed(tokens), prop] @ W_ih^T
    vocab_iota = lax.broadcasted_iota(jnp.int32, (TB, V), 1)
    onehot = (seq_ref[...] == vocab_iota).astype(jnp.float32)        # (TB, V)
    xp = (jnp.dot(onehot, emb_proj_ref[...],
                  preferred_element_type=jnp.float32)
          + jnp.dot(prop_ref[...], w_prop_ref[...],
                    preferred_element_type=jnp.float32)
          + b_ref[...])                                              # (TB, 4H)

    w_hh = w_hh_ref[...]                                             # stays in vregs

    # ---- recurrence: fully unrolled, state carried in vregs --------------
    h = jnp.zeros((batch, H), jnp.float32)
    c = jnp.zeros((batch, H), jnp.float32)
    hs = []
    for t in range(n_steps):                                         # static trip count
        gates = xp[t * batch:(t + 1) * batch, :] + jnp.dot(
            h, w_hh, preferred_element_type=jnp.float32)             # (B, 4H) = (8,128)
        # Two EUP passes over the full gates vreg; gate splits are lane slices.
        sg = jax.nn.sigmoid(gates)
        tg = jnp.tanh(gates)
        i_g = sg[:, 0 * H:1 * H]
        f_g = sg[:, 1 * H:2 * H]
        g_g = tg[:, 2 * H:3 * H]
        o_g = sg[:, 3 * H:4 * H]
        c = f_g * c + i_g * g_g
        h = o_g * jnp.tanh(c)
        hs.append(h)                                                 # value, no VMEM store

    # ---- hoisted linear head + sigmoid, lane-dense output ---------------
    h_all = jnp.concatenate(hs, axis=0)                              # (T*B, H)
    logits = lax.dot_general(                                        # w_lin @ h_all^T
        w_lin_ref[...], h_all,
        dimension_numbers=(((1,), (1,)), ((), ())),
        preferred_element_type=jnp.float32) + b_lin_ref[0]           # (1, T*B)
    y_ref[...] = jax.nn.sigmoid(logits)                              # single row store


def run_epitope_kernel(seq_col, prop_flat, emb_proj, w_prop, w_hh_t, b,
                       w_lin, b_lin, *, T, B):
    kern = functools.partial(epitope_fused_kernel, n_steps=T, batch=B)
    return pl.pallas_call(
        kern,
        out_shape=jax.ShapeDtypeStruct((1, T * B), jnp.float32),
        in_specs=[
            pl.BlockSpec(memory_space=pltpu.MemorySpace.VMEM),   # seq_col
            pl.BlockSpec(memory_space=pltpu.MemorySpace.VMEM),   # prop_flat
            pl.BlockSpec(memory_space=pltpu.MemorySpace.VMEM),   # emb_proj
            pl.BlockSpec(memory_space=pltpu.MemorySpace.VMEM),   # w_prop
            pl.BlockSpec(memory_space=pltpu.MemorySpace.VMEM),   # w_hh_t
            pl.BlockSpec(memory_space=pltpu.MemorySpace.VMEM),   # b
            pl.BlockSpec(memory_space=pltpu.MemorySpace.VMEM),   # w_lin
            pl.BlockSpec(memory_space=pltpu.MemorySpace.SMEM),   # b_lin scalar
        ],
        out_specs=pl.BlockSpec(memory_space=pltpu.MemorySpace.VMEM),
    )(seq_col, prop_flat, emb_proj, w_prop, w_hh_t, b, w_lin, b_lin)


# ------------------------------ forward (glue) -------------------------------
def _packed_gather_indices(lengths, T, row_stride):
    """Flat indices into the time-major (T, B_pad) output reproducing
    pack_padded_sequence(enforce_sorted=False) data order.  Host int math."""
    lengths = np.asarray(lengths)
    sorted_idx = np.argsort(-lengths, kind="stable")
    sorted_lengths = lengths[sorted_idx]
    idx = []
    for t in range(int(lengths.max())):
        n_valid = int(np.sum(sorted_lengths > t))
        if n_valid == 0:
            break
        idx.extend((t * row_stride + sorted_idx[:n_valid]).tolist())
    return np.asarray(idx, dtype=np.int32)


@jax.jit
def _epitope_forward_jit(params, sequences, properties, idx):
    """sequences: [T, B] int32, properties: [T, B, F] f32, idx: [N_packed] int32."""
    T, B = sequences.shape
    B_pad = ((B + SUBLANE - 1) // SUBLANE) * SUBLANE
    pad_b = B_pad - B

    # Pad batch to one sublane group; padded columns are never gathered.
    seq_p = jnp.pad(sequences, ((0, 0), (0, pad_b)))
    prop_p = jnp.pad(properties, ((0, 0), (0, pad_b), (0, 0)))
    seq_col = seq_p.reshape(T * B_pad, 1).astype(jnp.int32)
    prop_flat = prop_p.reshape(T * B_pad, -1).astype(jnp.float32)

    w_ih_t = params["w_ih"].T                                   # (D_in, 4H)
    emb_proj = jnp.dot(params["embedding"],
                       w_ih_t[:EMBED_SIZE, :])                  # (V, 4H)
    w_prop = w_ih_t[EMBED_SIZE:, :]                             # (F, 4H)
    w_hh_t = params["w_hh"].T                                   # (H, 4H)
    b = (params["b_ih"] + params["b_hh"])[None, :]              # (1, 4H)

    y_row = run_epitope_kernel(seq_col, prop_flat, emb_proj, w_prop, w_hh_t,
                               b, params["w_lin"], params["b_lin"],
                               T=T, B=B_pad)                    # (1, T*B_pad)

    # Pack reorder: one gather over the lane-dense row (fused under jit).
    return jnp.take(y_row[0], idx)[:, None]                     # [sum(lengths), 1]


def epitope_predictor_forward(params, sequences, properties, text_lengths):
    """Matches EpitopePredictor.forward: sigmoid(linear(LSTM(packed))) on the
    packed data, shape [sum(lengths), 1]."""
    T, B = sequences.shape
    B_pad = ((B + SUBLANE - 1) // SUBLANE) * SUBLANE
    idx = jnp.asarray(_packed_gather_indices(np.asarray(text_lengths), T, B_pad))
    return _epitope_forward_jit(params, sequences, properties, idx)


# ------------------------------ main ----------------------------------------
if __name__ == "__main__":
    key = jax.random.PRNGKey(0)
    ks = jax.random.split(key, 10)
    kinit = 1.0 / np.sqrt(HIDDEN)

    params = {
        "embedding": jax.random.normal(ks[0], (INPUT_SIZE, EMBED_SIZE),
                                       jnp.float32),
        "w_ih": jax.random.uniform(ks[1], (4 * HIDDEN, D_IN), jnp.float32,
                                   -kinit, kinit),
        "w_hh": jax.random.uniform(ks[2], (4 * HIDDEN, HIDDEN), jnp.float32,
                                   -kinit, kinit),
        "b_ih": jax.random.uniform(ks[3], (4 * HIDDEN,), jnp.float32,
                                   -kinit, kinit),
        "b_hh": jax.random.uniform(ks[4], (4 * HIDDEN,), jnp.float32,
                                   -kinit, kinit),
        "w_lin": jax.random.uniform(ks[5], (1, HIDDEN), jnp.float32,
                                    -kinit, kinit),
        "b_lin": jax.random.uniform(ks[6], (1,), jnp.float32, -kinit, kinit),
    }

    # Inputs: [T, B] token ids, [T, B, F] numeric properties, per-seq lengths.
    sequences = jax.random.randint(ks[7], (SEQ_LEN, BATCH), 0, INPUT_SIZE,
                                   dtype=jnp.int32)
    properties = jax.random.normal(ks[8], (SEQ_LEN, BATCH, NUM_FEAT),
                                   jnp.float32)
    text_lengths = np.array([8, 5, 7, 3], dtype=np.int32)

    out = epitope_predictor_forward(params, sequences, properties,
                                    text_lengths)
    out = jax.block_until_ready(out)
    assert out.shape == (int(text_lengths.sum()), 1)
    assert bool(jnp.all(jnp.isfinite(out)))
    assert bool(jnp.all((out > 0.0) & (out < 1.0)))
    print("KERNEL_OK")
</pallas_src>

<mosaic_0001>
module attributes {stable_mosaic.version = 11 : i64} {
  func.func @epitope_fused_kernel(%arg0: memref<64x1xi32, #tpu.memory_space<vmem>>, %arg1: memref<64x8xf32, #tpu.memory_space<vmem>>, %arg2: memref<20x128xf32, #tpu.memory_space<vmem>>, %arg3: memref<8x128xf32, #tpu.memory_space<vmem>>, %arg4: memref<32x128xf32, #tpu.memory_space<vmem>>, %arg5: memref<1x128xf32, #tpu.memory_space<vmem>>, %arg6: memref<1x32xf32, #tpu.memory_space<vmem>>, %arg7: memref<1xf32, #tpu.memory_space<smem>>, %arg8: memref<1x64xf32, #tpu.memory_space<vmem>>) attributes {dimension_semantics = [], scalar_prefetch = 0 : i64, scratch_operands = 0 : i64, tpu.core_type = #tpu.core_type<tc>} {
    %0 = tpu.iota {dimensions = array<i32: 1>} : vector<64x20xi32>
    %c0 = arith.constant 0 : index
    %c0_0 = arith.constant 0 : index
    %1 = vector.load %arg0[%c0, %c0_0] : memref<64x1xi32, #tpu.memory_space<vmem>>, vector<64x1xi32>
    %2 = vector.broadcast %1 : vector<64x1xi32> to vector<64x20xi32>
    %3 = arith.cmpi eq, %2, %0 : vector<64x20xi32>
    %4 = arith.extui %3 : vector<64x20xi1> to vector<64x20xi32>
    %5 = arith.sitofp %4 : vector<64x20xi32> to vector<64x20xf32>
    %c0_1 = arith.constant 0 : index
    %c0_2 = arith.constant 0 : index
    %6 = vector.load %arg2[%c0_1, %c0_2] : memref<20x128xf32, #tpu.memory_space<vmem>>, vector<20x128xf32>
    %cst = arith.constant dense<0.000000e+00> : vector<64x128xf32>
    %7 = tpu.matmul %5, %6, %cst {dimension_numbers = #tpu.dot_dimension_numbers<[1], [0], [0], [1], [0, 0, 1, 1], [], []>} : vector<64x20xf32>, vector<20x128xf32>, vector<64x128xf32> -> vector<64x128xf32>
    %c0_3 = arith.constant 0 : index
    %c0_4 = arith.constant 0 : index
    %8 = vector.load %arg1[%c0_3, %c0_4] : memref<64x8xf32, #tpu.memory_space<vmem>>, vector<64x8xf32>
    %c0_5 = arith.constant 0 : index
    %c0_6 = arith.constant 0 : index
    %9 = vector.load %arg3[%c0_5, %c0_6] : memref<8x128xf32, #tpu.memory_space<vmem>>, vector<8x128xf32>
    %cst_7 = arith.constant dense<0.000000e+00> : vector<64x128xf32>
    %10 = tpu.matmul %8, %9, %cst_7 {dimension_numbers = #tpu.dot_dimension_numbers<[1], [0], [0], [1], [0, 0, 1, 1], [], []>} : vector<64x8xf32>, vector<8x128xf32>, vector<64x128xf32> -> vector<64x128xf32>
    %11 = arith.addf %7, %10 : vector<64x128xf32>
    %c0_8 = arith.constant 0 : index
    %c0_9 = arith.constant 0 : index
    %12 = vector.load %arg5[%c0_8, %c0_9] : memref<1x128xf32, #tpu.memory_space<vmem>>, vector<1x128xf32>
    %13 = vector.broadcast %12 : vector<1x128xf32> to vector<64x128xf32>
    %14 = arith.addf %11, %13 : vector<64x128xf32>
    %c0_10 = arith.constant 0 : index
    %c0_11 = arith.constant 0 : index
    %15 = vector.load %arg4[%c0_10, %c0_11] : memref<32x128xf32, #tpu.memory_space<vmem>>, vector<32x128xf32>
    %cst_12 = arith.constant 0.000000e+00 : f32
    %16 = vector.broadcast %cst_12 : f32 to vector<8x32xf32>
    %cst_13 = arith.constant 0.000000e+00 : f32
    %17 = vector.broadcast %cst_13 : f32 to vector<8x32xf32>
    %18 = vector.extract_strided_slice %14 {offsets = [0, 0], sizes = [8, 128], strides = [1, 1]} : vector<64x128xf32> to vector<8x128xf32>
    %cst_14 = arith.constant dense<0.000000e+00> : vector<8x128xf32>
    %19 = tpu.matmul %16, %15, %cst_14 {dimension_numbers = #tpu.dot_dimension_numbers<[1], [0], [0], [1], [0, 0, 1, 1], [], []>} : vector<8x32xf32>, vector<32x128xf32>, vector<8x128xf32> -> vector<8x128xf32>
    %20 = arith.addf %18, %19 : vector<8x128xf32>
    %21 = arith.negf %20 : vector<8x128xf32>
    %22 = math.exp %21 : vector<8x128xf32>
    %cst_15 = arith.constant 1.000000e+00 : f32
    %23 = vector.broadcast %cst_15 : f32 to vector<8x128xf32>
    %24 = arith.addf %23, %22 : vector<8x128xf32>
    %25 = arith.divf %23, %24 : vector<8x128xf32>
    %26 = math.tanh %20 : vector<8x128xf32>
    %27 = vector.extract_strided_slice %25 {offsets = [0, 0], sizes = [8, 32], strides = [1, 1]} : vector<8x128xf32> to vector<8x32xf32>
    %28 = vector.extract_strided_slice %25 {offsets = [0, 32], sizes = [8, 32], strides = [1, 1]} : vector<8x128xf32> to vector<8x32xf32>
    %29 = vector.extract_strided_slice %26 {offsets = [0, 64], sizes = [8, 32], strides = [1, 1]} : vector<8x128xf32> to vector<8x32xf32>
    %30 = vector.extract_strided_slice %25 {offsets = [0, 96], sizes = [8, 32], strides = [1, 1]} : vector<8x128xf32> to vector<8x32xf32>
    %31 = arith.mulf %28, %17 : vector<8x32xf32>
    %32 = arith.mulf %27, %29 : vector<8x32xf32>
    %33 = arith.addf %31, %32 : vector<8x32xf32>
    %34 = math.tanh %33 : vector<8x32xf32>
    %35 = arith.mulf %30, %34 : vector<8x32xf32>
    %36 = vector.extract_strided_slice %14 {offsets = [8, 0], sizes = [8, 128], strides = [1, 1]} : vector<64x128xf32> to vector<8x128xf32>
    %cst_16 = arith.constant dense<0.000000e+00> : vector<8x128xf32>
    %37 = tpu.matmul %35, %15, %cst_16 {dimension_numbers = #tpu.dot_dimension_numbers<[1], [0], [0], [1], [0, 0, 1, 1], [], []>} : vector<8x32xf32>, vector<32x128xf32>, vector<8x128xf32> -> vector<8x128xf32>
    %38 = arith.addf %36, %37 : vector<8x128xf32>
    %39 = arith.negf %38 : vector<8x128xf32>
    %40 = math.exp %39 : vector<8x128xf32>
    %cst_17 = arith.constant 1.000000e+00 : f32
    %41 = vector.broadcast %cst_17 : f32 to vector<8x128xf32>
    %42 = arith.addf %41, %40 : vector<8x128xf32>
    %43 = arith.divf %41, %42 : vector<8x128xf32>
    %44 = math.tanh %38 : vector<8x128xf32>
    %45 = vector.extract_strided_slice %43 {offsets = [0, 0], sizes = [8, 32], strides = [1, 1]} : vector<8x128xf32> to vector<8x32xf32>
    %46 = vector.extract_strided_slice %43 {offsets = [0, 32], sizes = [8, 32], strides = [1, 1]} : vector<8x128xf32> to vector<8x32xf32>
    %47 = vector.extract_strided_slice %44 {offsets = [0, 64], sizes = [8, 32], strides = [1, 1]} : vector<8x128xf32> to vector<8x32xf32>
    %48 = vector.extract_strided_slice %43 {offsets = [0, 96], sizes = [8, 32], strides = [1, 1]} : vector<8x128xf32> to vector<8x32xf32>
    %49 = arith.mulf %46, %33 : vector<8x32xf32>
    %50 = arith.mulf %45, %47 : vector<8x32xf32>
    %51 = arith.addf %49, %50 : vector<8x32xf32>
    %52 = math.tanh %51 : vector<8x32xf32>
    %53 = arith.mulf %48, %52 : vector<8x32xf32>
    %54 = vector.extract_strided_slice %14 {offsets = [16, 0], sizes = [8, 128], strides = [1, 1]} : vector<64x128xf32> to vector<8x128xf32>
    %cst_18 = arith.constant dense<0.000000e+00> : vector<8x128xf32>
    %55 = tpu.matmul %53, %15, %cst_18 {dimension_numbers = #tpu.dot_dimension_numbers<[1], [0], [0], [1], [0, 0, 1, 1], [], []>} : vector<8x32xf32>, vector<32x128xf32>, vector<8x128xf32> -> vector<8x128xf32>
    %56 = arith.addf %54, %55 : vector<8x128xf32>
    %57 = arith.negf %56 : vector<8x128xf32>
    %58 = math.exp %57 : vector<8x128xf32>
    %cst_19 = arith.constant 1.000000e+00 : f32
    %59 = vector.broadcast %cst_19 : f32 to vector<8x128xf32>
    %60 = arith.addf %59, %58 : vector<8x128xf32>
    %61 = arith.divf %59, %60 : vector<8x128xf32>
    %62 = math.tanh %56 : vector<8x128xf32>
    %63 = vector.extract_strided_slice %61 {offsets = [0, 0], sizes = [8, 32], strides = [1, 1]} : vector<8x128xf32> to vector<8x32xf32>
    %64 = vector.extract_strided_slice %61 {offsets = [0, 32], sizes = [8, 32], strides = [1, 1]} : vector<8x128xf32> to vector<8x32xf32>
    %65 = vector.extract_strided_slice %62 {offsets = [0, 64], sizes = [8, 32], strides = [1, 1]} : vector<8x128xf32> to vector<8x32xf32>
    %66 = vector.extract_strided_slice %61 {offsets = [0, 96], sizes = [8, 32], strides = [1, 1]} : vector<8x128xf32> to vector<8x32xf32>
    %67 = arith.mulf %64, %51 : vector<8x32xf32>
    %68 = arith.mulf %63, %65 : vector<8x32xf32>
    %69 = arith.addf %67, %68 : vector<8x32xf32>
    %70 = math.tanh %69 : vector<8x32xf32>
    %71 = arith.mulf %66, %70 : vector<8x32xf32>
    %72 = vector.extract_strided_slice %14 {offsets = [24, 0], sizes = [8, 128], strides = [1, 1]} : vector<64x128xf32> to vector<8x128xf32>
    %cst_20 = arith.constant dense<0.000000e+00> : vector<8x128xf32>
    %73 = tpu.matmul %71, %15, %cst_20 {dimension_numbers = #tpu.dot_dimension_numbers<[1], [0], [0], [1], [0, 0, 1, 1], [], []>} : vector<8x32xf32>, vector<32x128xf32>, vector<8x128xf32> -> vector<8x128xf32>
    %74 = arith.addf %72, %73 : vector<8x128xf32>
    %75 = arith.negf %74 : vector<8x128xf32>
    %76 = math.exp %75 : vector<8x128xf32>
    %cst_21 = arith.constant 1.000000e+00 : f32
    %77 = vector.broadcast %cst_21 : f32 to vector<8x128xf32>
    %78 = arith.addf %77, %76 : vector<8x128xf32>
    %79 = arith.divf %77, %78 : vector<8x128xf32>
    %80 = math.tanh %74 : vector<8x128xf32>
    %81 = vector.extract_strided_slice %79 {offsets = [0, 0], sizes = [8, 32], strides = [1, 1]} : vector<8x128xf32> to vector<8x32xf32>
    %82 = vector.extract_strided_slice %79 {offsets = [0, 32], sizes = [8, 32], strides = [1, 1]} : vector<8x128xf32> to vector<8x32xf32>
    %83 = vector.extract_strided_slice %80 {offsets = [0, 64], sizes = [8, 32], strides = [1, 1]} : vector<8x128xf32> to vector<8x32xf32>
    %84 = vector.extract_strided_slice %79 {offsets = [0, 96], sizes = [8, 32], strides = [1, 1]} : vector<8x128xf32> to vector<8x32xf32>
    %85 = arith.mulf %82, %69 : vector<8x32xf32>
    %86 = arith.mulf %81, %83 : vector<8x32xf32>
    %87 = arith.addf %85, %86 : vector<8x32xf32>
    %88 = math.tanh %87 : vector<8x32xf32>
    %89 = arith.mulf %84, %88 : vector<8x32xf32>
    %90 = vector.extract_strided_slice %14 {offsets = [32, 0], sizes = [8, 128], strides = [1, 1]} : vector<64x128xf32> to vector<8x128xf32>
    %cst_22 = arith.constant dense<0.000000e+00> : vector<8x128xf32>
    %91 = tpu.matmul %89, %15, %cst_22 {dimension_numbers = #tpu.dot_dimension_numbers<[1], [0], [0], [1], [0, 0, 1, 1], [], []>} : vector<8x32xf32>, vector<32x128xf32>, vector<8x128xf32> -> vector<8x128xf32>
    %92 = arith.addf %90, %91 : vector<8x128xf32>
    %93 = arith.negf %92 : vector<8x128xf32>
    %94 = math.exp %93 : vector<8x128xf32>
    %cst_23 = arith.constant 1.000000e+00 : f32
    %95 = vector.broadcast %cst_23 : f32 to vector<8x128xf32>
    %96 = arith.addf %95, %94 : vector<8x128xf32>
    %97 = arith.divf %95, %96 : vector<8x128xf32>
    %98 = math.tanh %92 : vector<8x128xf32>
    %99 = vector.extract_strided_slice %97 {offsets = [0, 0], sizes = [8, 32], strides = [1, 1]} : vector<8x128xf32> to vector<8x32xf32>
    %100 = vector.extract_strided_slice %97 {offsets = [0, 32], sizes = [8, 32], strides = [1, 1]} : vector<8x128xf32> to vector<8x32xf32>
    %101 = vector.extract_strided_slice %98 {offsets = [0, 64], sizes = [8, 32], strides = [1, 1]} : vector<8x128xf32> to vector<8x32xf32>
    %102 = vector.extract_strided_slice %97 {offsets = [0, 96], sizes = [8, 32], strides = [1, 1]} : vector<8x128xf32> to vector<8x32xf32>
    %103 = arith.mulf %100, %87 : vector<8x32xf32>
    %104 = arith.mulf %99, %101 : vector<8x32xf32>
    %105 = arith.addf %103, %104 : vector<8x32xf32>
    %106 = math.tanh %105 : vector<8x32xf32>
    %107 = arith.mulf %102, %106 : vector<8x32xf32>
    %108 = vector.extract_strided_slice %14 {offsets = [40, 0], sizes = [8, 128], strides = [1, 1]} : vector<64x128xf32> to vector<8x128xf32>
    %cst_24 = arith.constant dense<0.000000e+00> : vector<8x128xf32>
    %109 = tpu.matmul %107, %15, %cst_24 {dimension_numbers = #tpu.dot_dimension_numbers<[1], [0], [0], [1], [0, 0, 1, 1], [], []>} : vector<8x32xf32>, vector<32x128xf32>, vector<8x128xf32> -> vector<8x128xf32>
    %110 = arith.addf %108, %109 : vector<8x128xf32>
    %111 = arith.negf %110 : vector<8x128xf32>
    %112 = math.exp %111 : vector<8x128xf32>
    %cst_25 = arith.constant 1.000000e+00 : f32
    %113 = vector.broadcast %cst_25 : f32 to vector<8x128xf32>
    %114 = arith.addf %113, %112 : vector<8x128xf32>
    %115 = arith.divf %113, %114 : vector<8x128xf32>
    %116 = math.tanh %110 : vector<8x128xf32>
    %117 = vector.extract_strided_slice %115 {offsets = [0, 0], sizes = [8, 32], strides = [1, 1]} : vector<8x128xf32> to vector<8x32xf32>
    %118 = vector.extract_strided_slice %115 {offsets = [0, 32], sizes = [8, 32], strides = [1, 1]} : vector<8x128xf32> to vector<8x32xf32>
    %119 = vector.extract_strided_slice %116 {offsets = [0, 64], sizes = [8, 32], strides = [1, 1]} : vector<8x128xf32> to vector<8x32xf32>
    %120 = vector.extract_strided_slice %115 {offsets = [0, 96], sizes = [8, 32], strides = [1, 1]} : vector<8x128xf32> to vector<8x32xf32>
    %121 = arith.mulf %118, %105 : vector<8x32xf32>
    %122 = arith.mulf %117, %119 : vector<8x32xf32>
    %123 = arith.addf %121, %122 : vector<8x32xf32>
    %124 = math.tanh %123 : vector<8x32xf32>
    %125 = arith.mulf %120, %124 : vector<8x32xf32>
    %126 = vector.extract_strided_slice %14 {offsets = [48, 0], sizes = [8, 128], strides = [1, 1]} : vector<64x128xf32> to vector<8x128xf32>
    %cst_26 = arith.constant dense<0.000000e+00> : vector<8x128xf32>
    %127 = tpu.matmul %125, %15, %cst_26 {dimension_numbers = #tpu.dot_dimension_numbers<[1], [0], [0], [1], [0, 0, 1, 1], [], []>} : vector<8x32xf32>, vector<32x128xf32>, vector<8x128xf32> -> vector<8x128xf32>
    %128 = arith.addf %126, %127 : vector<8x128xf32>
    %129 = arith.negf %128 : vector<8x128xf32>
    %130 = math.exp %129 : vector<8x128xf32>
    %cst_27 = arith.constant 1.000000e+00 : f32
    %131 = vector.broadcast %cst_27 : f32 to vector<8x128xf32>
    %132 = arith.addf %131, %130 : vector<8x128xf32>
    %133 = arith.divf %131, %132 : vector<8x128xf32>
    %134 = math.tanh %128 : vector<8x128xf32>
    %135 = vector.extract_strided_slice %133 {offsets = [0, 0], sizes = [8, 32], strides = [1, 1]} : vector<8x128xf32> to vector<8x32xf32>
    %136 = vector.extract_strided_slice %133 {offsets = [0, 32], sizes = [8, 32], strides = [1, 1]} : vector<8x128xf32> to vector<8x32xf32>
    %137 = vector.extract_strided_slice %134 {offsets = [0, 64], sizes = [8, 32], strides = [1, 1]} : vector<8x128xf32> to vector<8x32xf32>
    %138 = vector.extract_strided_slice %133 {offsets = [0, 96], sizes = [8, 32], strides = [1, 1]} : vector<8x128xf32> to vector<8x32xf32>
    %139 = arith.mulf %136, %123 : vector<8x32xf32>
    %140 = arith.mulf %135, %137 : vector<8x32xf32>
    %141 = arith.addf %139, %140 : vector<8x32xf32>
    %142 = math.tanh %141 : vector<8x32xf32>
    %143 = arith.mulf %138, %142 : vector<8x32xf32>
    %144 = vector.extract_strided_slice %14 {offsets = [56, 0], sizes = [8, 128], strides = [1, 1]} : vector<64x128xf32> to vector<8x128xf32>
    %cst_28 = arith.constant dense<0.000000e+00> : vector<8x128xf32>
    %145 = tpu.matmul %143, %15, %cst_28 {dimension_numbers = #tpu.dot_dimension_numbers<[1], [0], [0], [1], [0, 0, 1, 1], [], []>} : vector<8x32xf32>, vector<32x128xf32>, vector<8x128xf32> -> vector<8x128xf32>
    %146 = arith.addf %144, %145 : vector<8x128xf32>
    %147 = arith.negf %146 : vector<8x128xf32>
    %148 = math.exp %147 : vector<8x128xf32>
    %cst_29 = arith.constant 1.000000e+00 : f32
    %149 = vector.broadcast %cst_29 : f32 to vector<8x128xf32>
    %150 = arith.addf %149, %148 : vector<8x128xf32>
    %151 = arith.divf %149, %150 : vector<8x128xf32>
    %152 = math.tanh %146 : vector<8x128xf32>
    %153 = vector.extract_strided_slice %151 {offsets = [0, 0], sizes = [8, 32], strides = [1, 1]} : vector<8x128xf32> to vector<8x32xf32>
    %154 = vector.extract_strided_slice %151 {offsets = [0, 32], sizes = [8, 32], strides = [1, 1]} : vector<8x128xf32> to vector<8x32xf32>
    %155 = vector.extract_strided_slice %152 {offsets = [0, 64], sizes = [8, 32], strides = [1, 1]} : vector<8x128xf32> to vector<8x32xf32>
    %156 = vector.extract_strided_slice %151 {offsets = [0, 96], sizes = [8, 32], strides = [1, 1]} : vector<8x128xf32> to vector<8x32xf32>
    %157 = arith.mulf %154, %141 : vector<8x32xf32>
    %158 = arith.mulf %153, %155 : vector<8x32xf32>
    %159 = arith.addf %157, %158 : vector<8x32xf32>
    %160 = math.tanh %159 : vector<8x32xf32>
    %161 = arith.mulf %156, %160 : vector<8x32xf32>
    %162 = tpu.concatenate %35, %53, %71, %89, %107, %125, %143, %161 in 0 : vector<8x32xf32>, vector<8x32xf32>, vector<8x32xf32>, vector<8x32xf32>, vector<8x32xf32>, vector<8x32xf32>, vector<8x32xf32>, vector<8x32xf32> -> vector<64x32xf32>
    %c0_30 = arith.constant 0 : index
    %c0_31 = arith.constant 0 : index
    %163 = vector.load %arg6[%c0_30, %c0_31] : memref<1x32xf32, #tpu.memory_space<vmem>>, vector<1x32xf32>
    %cst_32 = arith.constant dense<0.000000e+00> : vector<1x64xf32>
    %164 = tpu.matmul %163, %162, %cst_32 {dimension_numbers = #tpu.dot_dimension_numbers<[1], [1], [0], [0], [0, 0, 1, 0], [], []>} : vector<1x32xf32>, vector<64x32xf32>, vector<1x64xf32> -> vector<1x64xf32>
    %c0_33 = arith.constant 0 : index
    %165 = memref.load %arg7[%c0_33] : memref<1xf32, #tpu.memory_space<smem>>
    %166 = vector.broadcast %165 : f32 to vector<1x64xf32>
    %167 = arith.addf %164, %166 : vector<1x64xf32>
    %168 = arith.negf %167 : vector<1x64xf32>
    %169 = math.exp %168 : vector<1x64xf32>
    %cst_34 = arith.constant 1.000000e+00 : f32
    %170 = vector.broadcast %cst_34 : f32 to vector<1x64xf32>
    %171 = arith.addf %170, %169 : vector<1x64xf32>
    %172 = arith.divf %170, %171 : vector<1x64xf32>
    %c0_35 = arith.constant 0 : index
    %c0_36 = arith.constant 0 : index
    %173 = vector.load %arg8[%c0_35, %c0_36] : memref<1x64xf32, #tpu.memory_space<vmem>>, vector<1x64xf32>
    tpu.vector_store %arg8[%c0_35, %c0_36], %172 {strides = array<i32>} : memref<1x64xf32, #tpu.memory_space<vmem>>, vector<1x64xf32>,
    return
  }
}

</mosaic_0001>

<bundles_post_ra>
// kernel: _epitope_forward_jit.1
= control target key start
LH: loop header
LB: loop body
LE: loop exit
PB: predicated region body
PF: predicated region fallthrough
CT: control target
= control target key end

     0   :  { %vm100_vm0 = vcmask 64512   ;;  %v1686_v0 = vmov 0   ;;  %v1687_v9 = vmov 0.0|0.0   ;;  %vm255_vm1 = vcmask 1043456   ;;  %s1691_s17 = smov 32   ;;  %s2018_s0 = inlined_call_operand.vmem [shape: s32[64,1], index: 0, kind: input, shape index: {}]   ;;  %s2019_s3 = inlined_call_operand.vmem [shape: f32[8,128], index: 3, kind: input, shape index: {}]   ;;  %s2020_s1 = inlined_call_operand.vmem [shape: f32[64,8], index: 1, kind: input, shape index: {}]   ;;  %s2021_s4 = inlined_call_operand.vmem [shape: f32[32,128], index: 4, kind: input, shape index: {}]   ;;  %s2022_s2 = inlined_call_operand.vmem [shape: f32[20,128], index: 2, kind: input, shape index: {}]   ;;  %s2023_s5 = inlined_call_operand.vmem [shape: f32[1,128], index: 5, kind: input, shape index: {}]   ;;  %s2024_s6 = inlined_call_operand.vmem [shape: f32[1,32], index: 6, kind: input, shape index: {}]   ;;  %s2025_s7 = inlined_call_operand.<no memory space> [shape: f32[1], index: 7, kind: input, shape index: {}]   ;;  %s2026_s8 = inlined_call_operand.vmem [shape: f32[1,64], index: 8, kind: output, shape index: {}]  }
   0x1   :  { %1616 = vset.pattern.permute.xlu0 %v1686_v0  ;;  %v32_v1 = vld [vmem:[%s2018_s0] sm:$0xff]  ;;  %1617 = vset.pattern.permute.xlu1 %v1686_v0  ;;  %v92_v4 = vld [vmem:[%s2020_s1 + $0x8] sm:$0xff]  ;;  %v93_v8 = vld [vmem:[%s2020_s1 + $0x10] sm:$0xff]  ;;  %vm1688_vm2 = vmmov 0   ;;  %v1689_v23 = vmov 0.0   ;;  %v30_v24 = vlaneseq  ;;  %vm230_vm3 = vcmask 162816  }
   0x2   :  { %v99_v2 = vld [vmem:[%s2019_s3] sm:$0xff]  ;;  %41 = vperm.xlu0 %1616, %v32_v1   ;;  %v33_v6 = vld [vmem:[%s2018_s0 + $0x8] sm:$0xff]  ;;  %v94_v13 = vld [vmem:[%s2020_s1 + $0x18] sm:$0xff]  ;;  %s1690_s3 = smov 64   ;;  %vm383_vm6 = vcmask 261120   ;;  %vm1269_vm14 = vcmask 516096  }
   0x3   :  { %1395 = vmatprep.subr.mxu1 %v99_v2  ;;  %v91_v3 = vld [vmem:[%s2020_s1] sm:$0xff]  ;;  %v380_v7 = vld [vmem:[%s2021_s4 + $0x8] sm:$0xff]  ;;  %v381_v15 = vld [vmem:[%s2021_s4 + $0x10] sm:$0xff]  ;;  %v1818_v25 = vand.u32 127, %v30_v24 }
   0x4   :  { %v379_v5 = vld [vmem:[%s2021_s4] sm:$0xff]  ;;  %1396 = vmatpush3.msra.mxu1 %v99_v2  ;;  %1397 = vmatprep.mubr.msk.f32.mxu1 %vm100_vm0, %v91_v3  ;;  %v89_v12 = vld [vmem:[%s2022_s2 + $0x8] sm:$0xff]  ;;  %v382_v16 = vld [vmem:[%s2021_s4 + $0x18] sm:$0xff] }
   0x5   :  { %1398 = vmatmul.mubr.msk.f32.vlgmr.msra.gmra.mrb[0].mxu1 %vm100_vm0, %v92_v4  ;;  %1538 = vmatprep.subr.bf16.mxu1 %v1687_v9  ;;  %v1764_v10 = vpack.c.bf16 %v380_v7, %v379_v5  ;;  %v88_v11 = vld [vmem:[%s2022_s2] sm:$0xff]  ;;  %v1786_v18 = vpack.c.bf16 %v382_v16, %v381_v15  ;;  %v90_v19 = vld [vmem:[%s2022_s2 + $0x10] sm:$0xf]  ;;  %v96_v20 = vld [vmem:[%s2020_s1 + $0x28] sm:$0xff] }
   0x6   :  { %1400 = vmatprep.mubr.msk.f32.mxu1 %vm100_vm0, %v93_v8  ;;  %v1534_v14 = vpack.c.bf16 %v89_v12, %v88_v11  ;;  %44 = vperm.xlu0 %1616, %v33_v6   ;;  %v95_v17 = vld [vmem:[%s2020_s1 + $0x20] sm:$0xff]  ;;  %v97_v21 = vld [vmem:[%s2020_s1 + $0x30] sm:$0xff]  ;;  %v98_v22 = vld [vmem:[%s2020_s1 + $0x38] sm:$0xff] }
   0x7   :  { %1540 = vmatpush3.bf16.msra.mxu1 %v1764_v10  ;;  %v1845_v43 = vld [vmem:[%s2023_s5] ss:$0 sm:$0xff]  ;;  %v34_v8 = vld [vmem:[%s2018_s0 + $0x10] sm:$0xff]  ;;  %v35_v15 = vld [vmem:[%s2018_s0 + $0x18] sm:$0xff] }
   0x8   :  { %1535 = vmatprep.subr.bf16.mxu0 %v1534_v14  ;;  %1541 = vmatprep.subr.bf16.mxu1 %v1687_v9  ;;  %vm1973_vm13 = vmpackc.low %vm383_vm6, %vm383_vm6 }
   0x9   :  { %1401 = vmatmul.mubr.msk.f32.gmra.mrb[2].mxu1 %vm100_vm0, %v94_v13  ;;  %1537 = vmatpush3.bf16.msra.mxu0 %v1534_v14 }
   0xa   :  { %1403 = vmatprep.mubr.msk.f32.mxu1 %vm100_vm0, %v95_v17  ;;  %1413 = vmatprep.subr.msk.mxu0 %vm255_vm1, %v90_v19 }
   0xb   :  { %1543 = vmatpush3.bf16.msra.mxu1 %v1786_v18 }
   0xc   :  { %1544 = vmatprep.subr.bf16.mxu1 %v1687_v9 }
   0xd   :  { %1404 = vmatmul.mubr.msk.f32.gmra.mrb[4].mxu1 %vm100_vm0, %v96_v20  ;;  %1414 = vmatpush3.msk.msra.mxu0 %vm255_vm1, %v90_v19 }
   0xe   :  { %1406 = vmatprep.mubr.msk.f32.mxu1 %vm100_vm0, %v97_v21  ;;  %1562 = vmatprep.subr.bf16.mxu0 %v1687_v9 }
  0x11   :  { %1407 = vmatmul.mubr.msk.f32.gmra.mrb[6].mxu1 %vm100_vm0, %v98_v22 }
  0x12   :  { %1435 = vmatprep.mubr.msk.f32.mxu1 %vm1688_vm2, %v1689_v23 }
  0x15   :  { %1436 = vmatmul.mubr.f32.vlgmr.msra.gmra.mrb[8].mxu1 %v1689_v23 }
  0x16   :  { %1546 = vmatpush3.bf16.msra.mxu1 %v1764_v10  ;;  %1446 = vmatprep.mubr.msk.f32.mxu1 %vm1688_vm2, %v1689_v23 }
  0x17   :  { %1547 = vmatprep.subr.bf16.mxu1 %v1687_v9 }
  0x1a   :  { %1549 = vmatpush3.bf16.msra.mxu1 %v1786_v18 }
  0x1b   :  { %1550 = vmatprep.subr.bf16.mxu1 %v1687_v9 }
  0x81   :  { %v42_v26 = vpop.permute.xlu0 %41 }
  0x82   :  { %vm64_vm4 = vcmp.eq.s32.totalorder %v42_v26, %v1818_v25 }
  0x83   :  { %v1275_v27 = vsel %vm64_vm4, 1.0, %v1689_v23 }
  0x84   :  { %1415 = vmatprep.mubr.msk.f32.mxu0 %vm230_vm3, %v1275_v27 }
  0x85   :  { %v45_v28 = vpop.permute.xlu0 %44 }
  0x86   :  { %vm65_vm5 = vcmp.eq.s32.totalorder %v45_v28, %v1818_v25 }
  0x87   :  { %v1276_v29 = vsel %vm65_vm5, 1.0, %v1689_v23 }
  0x88   :  { %1416 = vmatmul.mubr.msk.f32.vlgmr.msra.gmra.mrb[0].mxu0 %vm230_vm3, %v1276_v29 }
  0x89   :  { %1564 = vmatpush3.bf16.msra.mxu0 %v1764_v10 }
  0x8a   :  { %1565 = vmatprep.subr.bf16.mxu0 %v1687_v9 }
  0x8d   :  { %1567 = vmatpush3.bf16.msra.mxu0 %v1786_v18 }
  0x8e   :  { %1574 = vmatprep.subr.bf16.mxu0 %v1687_v9 }
  0xd8   :  { %v1399_v30 = vpop.f32.mrb[0].mxu1 }
  0xd9   :  { %v191_v31 = vpop.f32.mrb[1].mxu1 }
  0xdc   :  { %v1830_v32 = vpop.f32.mrb[2].mxu1 }
  0xdd   :  { %v1832_v33 = vpop.f32.mrb[3].mxu1 }
  0xe0   :  { %v1834_v34 = vpop.f32.mrb[4].mxu1 }
  0xe1   :  { %v1836_v35 = vpop.f32.mrb[5].mxu1 }
  0xe4   :  { %v1838_v36 = vpop.f32.mrb[6].mxu1 }
  0xe5   :  { %v1840_v37 = vpop.f32.mrb[7].mxu1 }
  0xe8   :  { %v453_v38 = vpop.f32.mrb[8].mxu1 }
  0xe9   :  { %v1437_v39 = vpop.f32.mrb[9].mxu1 }
 0x15b   :  { %v1417_v40 = vpop.f32.mrb[0].mxu0 }
 0x15c   :  { %v331_v41 = vadd.f32 %v1417_v40, %v1399_v30  ;;  %v325_v42 = vpop.f32.mrb[1].mxu0 }
 0x15d   :  { %v326_v44 = vadd.f32 %v325_v42, %v191_v31 }
 0x15e   :  { %v372_v61 = vadd.f32 %v1845_v43, %v331_v41 }
 0x15f   :  { %v371_v45 = vadd.f32 %v1845_v43, %v326_v44 }
 0x161   :  { %v457_v46 = vadd.f32 %v453_v38, %v371_v45 }
 0x163   :  { %1618 = vtanh.f32 %v457_v46  ;;  %v1301_v48 = vmul.f32 -1.442695, %v457_v46 }
 0x165   :  { %1620 = vpow2.f32 %v1301_v48 }
 0x16d   :  { %v1619_v47 = vpop.eup %1618 }
 0x16e   :  { %467 = vrot.lane.b32.xlu1 %v1619_v47, %s1690_s3 }
 0x16f   :  { %v1621_v49 = vpop.eup %1620 }
 0x170   :  { %v461_v50 = vadd.f32 1.0, %v1621_v49 }
 0x172   :  { %1622 = vrcp.f32 %v461_v50 }
 0x17c   :  { %v1623_v51 = vpop.eup %1622 }
 0x17d   :  { %v465_v54 = vmul.f32 0.0, %v1623_v51 }
 0x1e0   :  { %v468_v52 = vpop.permute.xlu1 %467 }
 0x1e1   :  { %v470_v53 = vmul.f32 %v1623_v51, %v468_v52 }
 0x1e3   :  { %472 = vrot.lane.b32.xlu1 %v470_v53, %s1691_s17 }
 0x255   :  { %v473_v55 = vpop.permute.xlu1 %472 }
 0x256   :  { %v475_v56 = vadd.f32 %v473_v55, %v465_v54 }
 0x258   :  { %1624 = vtanh.f32 %v475_v56 }
 0x262   :  { %v1625_v57 = vpop.eup %1624 }
 0x263   :  { %478 = vrot.lane.b32.xlu0 %v1625_v57, %s1690_s3 }
 0x2d5   :  { %v479_v58 = vpop.permute.xlu0 %478 }
 0x2d6   :  { %v481_v59 = vmul.f32 %v1623_v51, %v479_v58 }
 0x2d8   :  { %483 = vrot.lane.b32.xlu1 %v481_v59, %s1691_s17 }
 0x34a   :  { %v1852_v60 = vpop.permute.xlu1 %483 }
 0x34b   :  { %1447 = vmatmul.mubr.msk.f32.vlgmr.msra.gmra.mrb[10].mxu1 %vm383_vm6, %v1852_v60 }
 0x34c   :  { %1552 = vmatpush3.bf16.msra.mxu1 %v1764_v10  ;;  %1457 = vmatprep.mubr.msk.f32.mxu1 %vm1688_vm2, %v1689_v23 }
 0x34d   :  { %1553 = vmatprep.subr.bf16.mxu1 %v1687_v9 }
 0x350   :  { %1555 = vmatpush3.bf16.msra.mxu1 %v1786_v18 }
 0x351   :  { %1556 = vmatprep.subr.bf16.mxu1 %v1687_v9 }
 0x41e   :  { %v553_v62 = vpop.f32.mrb[10].mxu1 }
 0x41f   :  { %v557_v63 = vadd.f32 %v553_v62, %v372_v61  ;;  %v1448_v0 = vpop.f32.mrb[11].mxu1 }
 0x421   :  { %1626 = vtanh.f32 %v557_v63  ;;  %v1303_v2 = vmul.f32 -1.442695, %v557_v63 }
 0x423   :  { %1628 = vpow2.f32 %v1303_v2  ;;  %v38_v2 = vld [vmem:[%s2018_s0 + $0x30] sm:$0xff] }
 0x42b   :  { %v1627_v1 = vpop.eup %1626 }
 0x42c   :  { %567 = vrot.lane.b32.xlu0 %v1627_v1, %s1690_s3  ;;  %v36_v1 = vld [vmem:[%s2018_s0 + $0x20] sm:$0xff] }
 0x42d   :  { %v1629_v3 = vpop.eup %1628 }
 0x42e   :  { %v561_v4 = vadd.f32 1.0, %v1629_v3 }
 0x430   :  { %1630 = vrcp.f32 %v561_v4 }
 0x43a   :  { %v1631_v5 = vpop.eup %1630 }
 0x43b   :  { %v565_v11 = vmul.f32 %v1631_v5, %v475_v56 }
 0x49e   :  { %v568_v6 = vpop.permute.xlu0 %567 }
 0x49f   :  { %v570_v7 = vmul.f32 %v1631_v5, %v568_v6 }
 0x4a1   :  { %572 = vrot.lane.b32.xlu1 %v570_v7, %s1691_s17  ;;  %v37_v7 = vld [vmem:[%s2018_s0 + $0x28] sm:$0xff] }
 0x4a5   :  { %47 = vperm.xlu1 %1617, %v34_v8  }
 0x513   :  { %v573_v12 = vpop.permute.xlu1 %572 }
 0x514   :  { %v575_v13 = vadd.f32 %v573_v12, %v565_v11  ;;  %v39_v12 = vld [vmem:[%s2018_s0 + $0x38] sm:$0xff] }
 0x516   :  { %1632 = vtanh.f32 %v575_v13 }
 0x520   :  { %v1633_v14 = vpop.eup %1632 }
 0x521   :  { %578 = vrot.lane.b32.xlu0 %v1633_v14, %s1690_s3 }
 0x524   :  { %v48_v16 = vpop.permute.xlu1 %47 }
 0x525   :  { %50 = vperm.xlu0 %1616, %v35_v15   ;;  %vm66_vm7 = vcmp.eq.s32.totalorder %v48_v16, %v1818_v25 }
 0x526   :  { %v1277_v17 = vsel %vm66_vm7, 1.0, %v1689_v23 }
 0x527   :  { %1418 = vmatprep.mubr.msk.f32.mxu0 %vm230_vm3, %v1277_v17 }
 0x593   :  { %v579_v19 = vpop.permute.xlu0 %578 }
 0x594   :  { %v581_v20 = vmul.f32 %v1631_v5, %v579_v19 }
 0x596   :  { %583 = vrot.lane.b32.xlu1 %v581_v20, %s1691_s17 }
 0x5a4   :  { %v51_v21 = vpop.permute.xlu0 %50 }
 0x5a5   :  { %vm67_vm8 = vcmp.eq.s32.totalorder %v51_v21, %v1818_v25 }
 0x5a6   :  { %v1278_v22 = vsel %vm67_vm8, 1.0, %v1689_v23 }
 0x5a7   :  { %1419 = vmatmul.mubr.msk.f32.gmra.mrb[2].mxu0 %vm230_vm3, %v1278_v22 }
 0x608   :  { %v1879_v24 = vpop.permute.xlu1 %583 }
 0x609   :  { %1458 = vmatmul.mubr.msk.f32.vlgmr.msra.gmra.mrb[12].mxu1 %vm383_vm6, %v1879_v24 }
 0x60a   :  { %1558 = vmatpush3.bf16.msra.mxu1 %v1764_v10  ;;  %1468 = vmatprep.mubr.msk.f32.mxu1 %vm1688_vm2, %v1689_v23 }
 0x60b   :  { %1559 = vmatprep.subr.bf16.mxu1 %v1687_v9 }
 0x60e   :  { %1561 = vmatpush3.bf16.msra.mxu1 %v1786_v18 }
 0x60f   :  { %1568 = vmatprep.subr.bf16.mxu1 %v1687_v9 }
 0x67a   :  { %v1420_v26 = vpop.f32.mrb[2].mxu0 }
 0x67b   :  { %v341_v27 = vadd.f32 %v1420_v26, %v1830_v32  ;;  %v335_v28 = vpop.f32.mrb[3].mxu0 }
 0x67c   :  { %v336_v29 = vadd.f32 %v335_v28, %v1832_v33 }
 0x67d   :  { %v374_v53 = vadd.f32 %v1845_v43, %v341_v27 }
 0x67e   :  { %v373_v30 = vadd.f32 %v1845_v43, %v336_v29 }
 0x6dc   :  { %v653_v31 = vpop.f32.mrb[12].mxu1 }
 0x6dd   :  { %v657_v38 = vadd.f32 %v653_v31, %v373_v30  ;;  %v1459_v39 = vpop.f32.mrb[13].mxu1 }
 0x6df   :  { %1634 = vtanh.f32 %v657_v38  ;;  %v1305_v41 = vmul.f32 -1.442695, %v657_v38 }
 0x6e1   :  { %1636 = vpow2.f32 %v1305_v41 }
 0x6e9   :  { %v1635_v40 = vpop.eup %1634 }
 0x6ea   :  { %667 = vrot.lane.b32.xlu0 %v1635_v40, %s1690_s3 }
 0x6eb   :  { %v1637_v42 = vpop.eup %1636 }
 0x6ec   :  { %v661_v44 = vadd.f32 1.0, %v1637_v42 }
 0x6ee   :  { %1638 = vrcp.f32 %v661_v44 }
 0x6f8   :  { %v1639_v45 = vpop.eup %1638 }
 0x6f9   :  { %v665_v33 = vmul.f32 %v1639_v45, %v575_v13 }
 0x75c   :  { %v668_v46 = vpop.permute.xlu0 %667 }
 0x75d   :  { %v670_v32 = vmul.f32 %v1639_v45, %v668_v46 }
 0x75f   :  { %672 = vrot.lane.b32.xlu1 %v670_v32, %s1691_s17 }
 0x7d1   :  { %v673_v47 = vpop.permute.xlu1 %672 }
 0x7d2   :  { %v675_v48 = vadd.f32 %v673_v47, %v665_v33 }
 0x7d4   :  { %1640 = vtanh.f32 %v675_v48 }
 0x7de   :  { %v1641_v49 = vpop.eup %1640 }
 0x7df   :  { %678 = vrot.lane.b32.xlu0 %v1641_v49, %s1690_s3 }
 0x851   :  { %v679_v50 = vpop.permute.xlu0 %678 }
 0x852   :  { %v681_v51 = vmul.f32 %v1639_v45, %v679_v50 }
 0x854   :  { %683 = vrot.lane.b32.xlu1 %v681_v51, %s1691_s17 }
 0x8c6   :  { %v1896_v52 = vpop.permute.xlu1 %683 }
 0x8c7   :  { %1469 = vmatmul.mubr.msk.f32.vlgmr.msra.gmra.mrb[14].mxu1 %vm383_vm6, %v1896_v52 }
 0x8c8   :  { %1570 = vmatpush3.bf16.msra.mxu1 %v1764_v10  ;;  %1490 = vmatprep.mubr.msk.f32.mxu1 %vm1688_vm2, %v1689_v23 }
 0x8c9   :  { %1571 = vmatprep.subr.bf16.mxu1 %v1687_v9 }
 0x8cc   :  { %1573 = vmatpush3.bf16.msra.mxu1 %v1786_v18 }
 0x8cd   :  { %1580 = vmatprep.subr.bf16.mxu1 %v1687_v9 }
 0x99a   :  { %v753_v54 = vpop.f32.mrb[14].mxu1 }
 0x99b   :  { %v757_v55 = vadd.f32 %v753_v54, %v374_v53  ;;  %v1470_v56 = vpop.f32.mrb[15].mxu1 }
 0x99d   :  { %1642 = vtanh.f32 %v757_v55  ;;  %v1307_v58 = vmul.f32 -1.442695, %v757_v55 }
 0x99f   :  { %1644 = vpow2.f32 %v1307_v58 }
 0x9a7   :  { %v1643_v57 = vpop.eup %1642 }
 0x9a8   :  { %767 = vrot.lane.b32.xlu0 %v1643_v57, %s1690_s3 }
 0x9a9   :  { %v1645_v59 = vpop.eup %1644 }
 0x9aa   :  { %v761_v61 = vadd.f32 1.0, %v1645_v59 }
 0x9ac   :  { %1646 = vrcp.f32 %v761_v61 }
 0x9b6   :  { %v1647_v62 = vpop.eup %1646 }
 0x9b7   :  { %v765_v3 = vmul.f32 %v1647_v62, %v675_v48 }
 0xa1a   :  { %v768_v63 = vpop.permute.xlu0 %767 }
 0xa1b   :  { %v770_v0 = vmul.f32 %v1647_v62, %v768_v63 }
 0xa1d   :  { %772 = vrot.lane.b32.xlu1 %v770_v0, %s1691_s17 }
 0xa21   :  { %53 = vperm.xlu1 %1617, %v36_v1  }
 0xa25   :  { %59 = vperm.xlu1 %1617, %v38_v2  }
 0xa8f   :  { %v773_v4 = vpop.permute.xlu1 %772 }
 0xa90   :  { %v775_v5 = vadd.f32 %v773_v4, %v765_v3 }
 0xa92   :  { %1648 = vtanh.f32 %v775_v5 }
 0xa9c   :  { %v1649_v6 = vpop.eup %1648 }
 0xa9d   :  { %778 = vrot.lane.b32.xlu0 %v1649_v6, %s1690_s3  ;;  %v1587_v6 = vpack.c.bf16 %v1879_v24, %v1852_v60 }
 0xaa0   :  { %v54_v8 = vpop.permute.xlu1 %53 }
 0xaa1   :  { %vm68_vm9 = vcmp.eq.s32.totalorder %v54_v8, %v1818_v25  ;;  %56 = vperm.xlu0 %1616, %v37_v7  }
 0xaa2   :  { %v1279_v11 = vsel %vm68_vm9, 1.0, %v1689_v23 }
 0xaa3   :  { %1421 = vmatprep.mubr.msk.f32.mxu0 %vm230_vm3, %v1279_v11 }
 0xaa4   :  { %v60_v15 = vpop.permute.xlu1 %59 }
 0xaa5   :  { %62 = vperm.xlu0 %1616, %v39_v12   ;;  %vm70_vm10 = vcmp.eq.s32.totalorder %v60_v15, %v1818_v25 }
 0xaa6   :  { %v1281_v19 = vsel %vm70_vm10, 1.0, %v1689_v23 }
 0xb0f   :  { %v779_v13 = vpop.permute.xlu0 %778 }
 0xb10   :  { %v781_v14 = vmul.f32 %v1647_v62, %v779_v13 }
 0xb12   :  { %783 = vrot.lane.b32.xlu1 %v781_v14, %s1691_s17 }
 0xb20   :  { %v57_v16 = vpop.permute.xlu0 %56 }
 0xb21   :  { %vm69_vm11 = vcmp.eq.s32.totalorder %v57_v16, %v1818_v25 }
 0xb22   :  { %v1280_v17 = vsel %vm69_vm11, 1.0, %v1689_v23 }
 0xb23   :  { %1422 = vmatmul.mubr.msk.f32.gmra.mrb[4].mxu0 %vm230_vm3, %v1280_v17 }
 0xb24   :  { %1424 = vmatprep.mubr.msk.f32.mxu0 %vm230_vm3, %v1281_v19  ;;  %v63_v20 = vpop.permute.xlu0 %62 }
 0xb25   :  { %vm71_vm12 = vcmp.eq.s32.totalorder %v63_v20, %v1818_v25 }
 0xb26   :  { %v1282_v21 = vsel %vm71_vm12, 1.0, %v1689_v23 }
 0xb27   :  { %1425 = vmatmul.mubr.msk.f32.gmra.mrb[6].mxu0 %vm230_vm3, %v1282_v21 }
 0xb28   :  { %1479 = vmatprep.mubr.msk.f32.mxu0 %vm1688_vm2, %v1689_v23 }
 0xb84   :  { %v1937_v22 = vpop.permute.xlu1 %783 }
 0xb85   :  { %1480 = vmatmul.mubr.msk.f32.vlgmr.msra.gmra.mrb[8].mxu0 %vm383_vm6, %v1937_v22  ;;  %v1591_v8 = vpack.c.bf16 %v1937_v22, %v1896_v52 }
 0xb86   :  { %1576 = vmatpush3.bf16.msra.mxu0 %v1764_v10  ;;  %1501 = vmatprep.mubr.msk.f32.mxu0 %vm1688_vm2, %v1689_v23 }
 0xb87   :  { %1577 = vmatprep.subr.bf16.mxu0 %v1687_v9 }
 0xb8a   :  { %1579 = vmatpush3.bf16.msra.mxu0 %v1786_v18 }
 0xb8b   :  { %1586 = vmatprep.subr.bf16.mxu0 %v1687_v9 }
 0xbf6   :  { %v1423_v25 = vpop.f32.mrb[4].mxu0 }
 0xbf7   :  { %v351_v26 = vadd.f32 %v1423_v25, %v1834_v34  ;;  %v345_v27 = vpop.f32.mrb[5].mxu0 }
 0xbf8   :  { %v346_v28 = vadd.f32 %v345_v27, %v1836_v35 }
 0xbf9   :  { %v376_v53 = vadd.f32 %v1845_v43, %v351_v26 }
 0xbfa   :  { %v1426_v29 = vpop.f32.mrb[6].mxu0  ;;  %v375_v39 = vadd.f32 %v1845_v43, %v346_v28 }
 0xbfb   :  { %v1950_v30 = vadd.f32 %v1426_v29, %v1838_v36  ;;  %v355_v31 = vpop.f32.mrb[7].mxu0 }
 0xbfc   :  { %v1953_v38 = vadd.f32 %v355_v31, %v1840_v37 }
 0xbfd   :  { %v378_v28 = vadd.f32 %v1845_v43, %v1950_v30 }
 0xbfe   :  { %v377_v24 = vadd.f32 %v1845_v43, %v1953_v38 }
 0xc58   :  { %v853_v40 = vpop.f32.mrb[8].mxu0 }
 0xc59   :  { %v857_v41 = vadd.f32 %v853_v40, %v375_v39  ;;  %v1481_v42 = vpop.f32.mrb[9].mxu0 }
 0xc5b   :  { %1650 = vtanh.f32 %v857_v41  ;;  %v1309_v34 = vmul.f32 -1.442695, %v857_v41 }
 0xc5d   :  { %1652 = vpow2.f32 %v1309_v34 }
 0xc65   :  { %v1651_v44 = vpop.eup %1650 }
 0xc66   :  { %867 = vrot.lane.b32.xlu0 %v1651_v44, %s1690_s3 }
 0xc67   :  { %v1653_v35 = vpop.eup %1652 }
 0xc68   :  { %v861_v45 = vadd.f32 1.0, %v1653_v35 }
 0xc6a   :  { %1654 = vrcp.f32 %v861_v45 }
 0xc74   :  { %v1655_v36 = vpop.eup %1654 }
 0xc75   :  { %v865_v37 = vmul.f32 %v1655_v36, %v775_v5 }
 0xcd8   :  { %v868_v46 = vpop.permute.xlu0 %867 }
 0xcd9   :  { %v870_v32 = vmul.f32 %v1655_v36, %v868_v46 }
 0xcdb   :  { %872 = vrot.lane.b32.xlu1 %v870_v32, %s1691_s17 }
 0xd4d   :  { %v873_v33 = vpop.permute.xlu1 %872 }
 0xd4e   :  { %v875_v47 = vadd.f32 %v873_v33, %v865_v37 }
 0xd50   :  { %1656 = vtanh.f32 %v875_v47 }
 0xd5a   :  { %v1657_v48 = vpop.eup %1656 }
 0xd5b   :  { %878 = vrot.lane.b32.xlu0 %v1657_v48, %s1690_s3  ;;  %v1184_v48 = vstv %s2025_s7 }
 0xdcd   :  { %v879_v49 = vpop.permute.xlu0 %878 }
 0xdce   :  { %v881_v50 = vmul.f32 %v1655_v36, %v879_v49 }
 0xdd0   :  { %883 = vrot.lane.b32.xlu1 %v881_v50, %s1691_s17 }
 0xe42   :  { %v884_v51 = vpop.permute.xlu1 %883 }
 0xe43   :  { %1491 = vmatmul.mubr.msk.f32.vlgmr.msra.gmra.mrb[16].mxu1 %vm383_vm6, %v884_v51 }
 0xe44   :  { %1582 = vmatpush3.bf16.msra.mxu1 %v1764_v10  ;;  %1512 = vmatprep.mubr.msk.f32.mxu1 %vm1688_vm2, %v1689_v23 }
 0xe45   :  { %1583 = vmatprep.subr.bf16.mxu1 %v1687_v9 }
 0xe48   :  { %1585 = vmatpush3.bf16.msra.mxu1 %v1786_v18 }
 0xf16   :  { %v953_v54 = vpop.f32.mrb[16].mxu1 }
 0xf17   :  { %v957_v55 = vadd.f32 %v953_v54, %v376_v53  ;;  %v1492_v56 = vpop.f32.mrb[17].mxu1 }
 0xf19   :  { %1658 = vtanh.f32 %v957_v55  ;;  %v1311_v58 = vmul.f32 -1.442695, %v957_v55 }
 0xf1b   :  { %1660 = vpow2.f32 %v1311_v58 }
 0xf23   :  { %v1659_v57 = vpop.eup %1658 }
 0xf24   :  { %967 = vrot.lane.b32.xlu0 %v1659_v57, %s1690_s3 }
 0xf25   :  { %v1661_v59 = vpop.eup %1660 }
 0xf26   :  { %v961_v10 = vadd.f32 1.0, %v1661_v59 }
 0xf28   :  { %1662 = vrcp.f32 %v961_v10 }
 0xf32   :  { %v1663_v61 = vpop.eup %1662 }
 0xf33   :  { %v965_v18 = vmul.f32 %v1663_v61, %v875_v47  ;;  %v1182_v47 = vld [vmem:[%s2024_s6] sm:$0x1] }
 0xf96   :  { %v968_v62 = vpop.permute.xlu0 %967 }
 0xf97   :  { %v970_v63 = vmul.f32 %v1663_v61, %v968_v62 }
 0xf99   :  { %972 = vrot.lane.b32.xlu1 %v970_v63, %s1691_s17 }
0x100b   :  { %v973_v0 = vpop.permute.xlu1 %972 }
0x100c   :  { %v975_v1 = vadd.f32 %v973_v0, %v965_v18 }
0x100e   :  { %1664 = vtanh.f32 %v975_v1 }
0x1018   :  { %v1665_v2 = vpop.eup %1664 }
0x1019   :  { %978 = vrot.lane.b32.xlu0 %v1665_v2, %s1690_s3 }
0x108b   :  { %v979_v3 = vpop.permute.xlu0 %978 }
0x108c   :  { %v981_v4 = vmul.f32 %v1663_v61, %v979_v3 }
0x108e   :  { %983 = vrot.lane.b32.xlu1 %v981_v4, %s1691_s17 }
0x1100   :  { %v984_v7 = vpop.permute.xlu1 %983 }
0x1101   :  { %1502 = vmatmul.mubr.msk.f32.vlgmr.msra.gmra.mrb[10].mxu0 %vm383_vm6, %v984_v7  ;;  %v1595_v60 = vpack.c.bf16 %v984_v7, %v884_v51 }
0x1102   :  { %1589 = vmatpush3.bf16.xpose.msk.msra.mxu0 %vm1973_vm13, %v1587_v6  ;;  %1531 = vmatprep.mubr.msk.f32.mxu0 %vm1688_vm2, %v1689_v23 }
0x1103   :  { %1590 = vmatprep.subr.bf16.mxu0 %v1687_v9 }
0x110a   :  { %1593 = vmatpush3.bf16.xpose.msk.msra.mxu0 %vm1973_vm13, %v1591_v8 }
0x110b   :  { %1594 = vmatprep.subr.bf16.mxu0 %v1687_v9 }
0x1112   :  { %1597 = vmatpush3.bf16.xpose.msk.msra.mxu0 %vm1973_vm13, %v1595_v60 }
0x1113   :  { %1598 = vmatprep.subr.bf16.mxu0 %v1687_v9 }
0x11d4   :  { %v1053_v23 = vpop.f32.mrb[10].mxu0 }
0x11d5   :  { %v1057_v11 = vadd.f32 %v1053_v23, %v377_v24  ;;  %v1503_v12 = vpop.f32.mrb[11].mxu0 }
0x11d7   :  { %1666 = vtanh.f32 %v1057_v11  ;;  %v1313_v52 = vmul.f32 -1.442695, %v1057_v11 }
0x11d9   :  { %1668 = vpow2.f32 %v1313_v52 }
0x11e1   :  { %v1667_v13 = vpop.eup %1666 }
0x11e2   :  { %1067 = vrot.lane.b32.xlu0 %v1667_v13, %s1690_s3 }
0x11e3   :  { %v1669_v14 = vpop.eup %1668 }
0x11e4   :  { %v1061_v15 = vadd.f32 1.0, %v1669_v14 }
0x11e6   :  { %1670 = vrcp.f32 %v1061_v15 }
0x11f0   :  { %v1671_v16 = vpop.eup %1670 }
0x11f1   :  { %v1065_v9 = vmul.f32 %v1671_v16, %v975_v1 }
0x1254   :  { %v1068_v17 = vpop.permute.xlu0 %1067 }
0x1255   :  { %v1070_v19 = vmul.f32 %v1671_v16, %v1068_v17 }
0x1257   :  { %1072 = vrot.lane.b32.xlu1 %v1070_v19, %s1691_s17 }
0x12c9   :  { %v1073_v20 = vpop.permute.xlu1 %1072 }
0x12ca   :  { %v1075_v21 = vadd.f32 %v1073_v20, %v1065_v9 }
0x12cc   :  { %1672 = vtanh.f32 %v1075_v21 }
0x12d6   :  { %v1673_v22 = vpop.eup %1672 }
0x12d7   :  { %1078 = vrot.lane.b32.xlu0 %v1673_v22, %s1690_s3 }
0x1349   :  { %v1079_v25 = vpop.permute.xlu0 %1078 }
0x134a   :  { %v1081_v26 = vmul.f32 %v1671_v16, %v1079_v25 }
0x134c   :  { %1083 = vrot.lane.b32.xlu1 %v1081_v26, %s1691_s17 }
0x13be   :  { %v1084_v27 = vpop.permute.xlu1 %1083 }
0x13bf   :  { %1513 = vmatmul.mubr.msk.f32.vlgmr.msra.gmra.mrb[18].mxu1 %vm383_vm6, %v1084_v27 }
0x1492   :  { %v1153_v29 = vpop.f32.mrb[18].mxu1 }
0x1493   :  { %v1157_v31 = vadd.f32 %v1153_v29, %v378_v28  ;;  %v1514_v38 = vpop.f32.mrb[19].mxu1 }
0x1495   :  { %1674 = vtanh.f32 %v1157_v31  ;;  %v1315_v40 = vmul.f32 -1.442695, %v1157_v31 }
0x1497   :  { %1676 = vpow2.f32 %v1315_v40 }
0x149f   :  { %v1675_v39 = vpop.eup %1674 }
0x14a0   :  { %1167 = vrot.lane.b32.xlu0 %v1675_v39, %s1690_s3 }
0x14a1   :  { %v1677_v41 = vpop.eup %1676 }
0x14a2   :  { %v1161_v42 = vadd.f32 1.0, %v1677_v41 }
0x14a4   :  { %1678 = vrcp.f32 %v1161_v42 }
0x14ae   :  { %v1679_v44 = vpop.eup %1678 }
0x14af   :  { %v1165_v45 = vmul.f32 %v1679_v44, %v1075_v21 }
0x1512   :  { %v1168_v34 = vpop.permute.xlu0 %1167 }
0x1513   :  { %v1170_v35 = vmul.f32 %v1679_v44, %v1168_v34 }
0x1515   :  { %1172 = vrot.lane.b32.xlu1 %v1170_v35, %s1691_s17 }
0x1587   :  { %v1173_v36 = vpop.permute.xlu1 %1172 }
0x1588   :  { %v1175_v43 = vadd.f32 %v1173_v36, %v1165_v45 }
0x158a   :  { %1680 = vtanh.f32 %v1175_v43 }
0x1594   :  { %v1681_v30 = vpop.eup %1680 }
0x1595   :  { %1178 = vrot.lane.b32.xlu0 %v1681_v30, %s1690_s3 }
0x1607   :  { %v1179_v46 = vpop.permute.xlu0 %1178 }
0x1608   :  { %v1181_v32 = vmul.f32 %v1679_v44, %v1179_v46 }
0x160a   :  { %1186 = vrot.lane.b32.xlu1 %v1181_v32, %s1691_s17 }
0x167c   :  { %v1187_v37 = vpop.permute.xlu1 %1186 }
0x167d   :  { %v1599_v33 = vpack.c.bf16 %v1187_v37, %v1084_v27 }
0x167f   :  { %1601 = vmatpush3.bf16.xpose.msk.msra.mxu0 %vm1973_vm13, %v1599_v33 }
0x1686   :  { %1532 = vmatmul.mubr.msk.f32.vlgmr.msra.gmra.mrb[12].mxu0 %vm383_vm6, %v1182_v47 }
0x1759   :  { %v1259_v49 = vpop.f32.mrb[12].mxu0 }
0x175a   :  { %v1260_v50 = vadd.f32 %v1259_v49, %v1184_v48  ;;  %v1533_v51 = vpop.f32.mrb[13].mxu0 }
0x175c   :  { %v1325_v53 = vmul.f32 -1.442695, %v1260_v50 }
0x175e   :  { %1682 = vpow2.f32 %v1325_v53 }
0x1768   :  { %v1683_v54 = vpop.eup %1682 }
0x1769   :  { %v1266_v55 = vadd.f32 1.0, %v1683_v54 }
0x176b   :  { %1684 = vrcp.f32 %v1266_v55 }
0x1775   :  { %v1685_v56 = vpop.eup %1684 }
0x1776   :  { %1270 = vst.msk [vmem:[%s2026_s8] sm:$0x1] %vm1269_vm14, %v1685_v56 }

</bundles_post_ra>
